<compile_context>
chip_gen: v7x
topology: tpu7x:2x2x1
jax: 0.10.0
libtpu: 0.0.40
codegen_flags: <defaults>
</compile_context>

<pallas_src>
import functools

import jax
import jax.numpy as jnp
from jax.experimental import pallas as pl
from jax.experimental.pallas import tpu as pltpu

_MARGIN = 0.0
_EPS = 1e-12

# Conservative, generation-robust VMEM sizing:
#  - tile working-set budget fits comfortably inside v7x's 64 MiB-per-TC VMEM,
#  - scoped limit raised above v5e's 16 MiB / v6e's 32 MiB defaults.
_TILE_VMEM_BUDGET = 32 * 1024 * 1024
_VMEM_LIMIT_BYTES = 48 * 1024 * 1024


def _cel_kernel(x_ref, y_ref, lab_ref, out_ref, *, n_rows, tiles_per_slice):
    c = pl.program_id(0)   # core-slice axis ("parallel": split across TCs on v7x)
    t = pl.program_id(1)   # batch-tile axis ("arbitrary": serial reduction)

    # Resident (1,1,1) output block per slice acts as that slice's accumulator.
    @pl.when(t == 0)
    def _init():
        out_ref[...] = jnp.zeros_like(out_ref)

    tm = x_ref.shape[0]
    x = x_ref[...].astype(jnp.float32)          # (TM, D)
    y = y_ref[...].astype(jnp.float32)          # (TM, D)
    lab = lab_ref[...]                          # (TM, 1) float32 (+1 / -1)

    dot = jnp.sum(x * y, axis=-1, keepdims=True)            # (TM, 1)
    nx = jnp.sum(x * x, axis=-1, keepdims=True) + _EPS       # (TM, 1)
    ny = jnp.sum(y * y, axis=-1, keepdims=True) + _EPS       # (TM, 1)
    cos = dot * jax.lax.rsqrt(nx * ny)                        # (TM, 1)

    pos = 1.0 - cos                                           # label == +1 branch
    neg = jnp.maximum(cos - _MARGIN, 0.0)                     # label == -1 branch
    per_row = jnp.where(lab > 0.0, pos, neg)                  # (TM, 1)

    # Mask the ragged tail and any duplicate (clamped) blocks: rows >= n contribute 0.
    # jnp.where is a select, so garbage / NaN in out-of-bounds rows never propagates.
    row0 = (c * tiles_per_slice + t) * tm
    row_ids = row0 + jax.lax.broadcasted_iota(jnp.int32, (tm, 1), 0)
    per_row = jnp.where(row_ids < n_rows, per_row, 0.0)

    out_ref[...] += jnp.sum(per_row, axis=0, keepdims=True)[None]   # (1,1,1) partial


def _choose_tm(n, d, itemsize):
    """Batch-tile rows sized by a VMEM byte budget (lane padding accounted for)."""
    sub = max(8, 32 // itemsize)                      # sublane multiple (f32:8 bf16:16 i8:32)
    d_pad = ((max(d, 1) + 127) // 128) * 128          # lane-padded feature width in VMEM
    # Per-row VMEM bytes:
    #   x + y tiles (lane padded, double-buffered) + label tile (f32, padded to 128
    #   lanes, double-buffered) + ~4 tile-sized f32 working temporaries (casts,
    #   x*y / x*x / y*y before the lane reduction).
    per_row = 2 * (2 * d_pad * itemsize + 128 * 4) + 4 * d_pad * 4
    tm = _TILE_VMEM_BUDGET // max(per_row, 1)
    tm = max(sub, (tm // sub) * sub)
    n_round = ((n + sub - 1) // sub) * sub            # don't tile past the batch itself
    return int(min(tm, n_round))


def cosine_embedding_loss(x, y, label, *, tm=None):
    """x, y: (N, D); label: (N,) of +1 / -1. Returns scalar float32 mean loss."""
    n, d = x.shape
    if n == 0:
        # PyTorch mean reduction over an empty batch -> NaN (the zero_size case).
        return jnp.float32(jnp.nan)
    if d == 0:
        # Empty feature dim: cos == 0 for every row (eps denominator).
        labf = label.astype(jnp.float32)
        return jnp.mean(jnp.where(labf > 0.0, 1.0, 0.0)).astype(jnp.float32)

    itemsize = jnp.dtype(x.dtype).itemsize
    sub = max(8, 32 // itemsize)
    if tm is None:
        tm = _choose_tm(n, d, itemsize)
    else:
        tm = max(sub, ((tm + sub - 1) // sub) * sub)

    lab2d = label.astype(jnp.float32).reshape(n, 1)

    n_blocks = pl.cdiv(n, tm)
    num_slices = min(2, n_blocks)                 # use both TCs on v7x; harmless on v5e/v6e
    tiles_per_slice = pl.cdiv(n_blocks, num_slices)

    def row_block(c, t):
        # Clamp blocks past the end (num_slices may not divide n_blocks); their rows
        # are >= n and get masked to zero inside the kernel.
        return jnp.minimum(c * tiles_per_slice + t, n_blocks - 1)

    kernel = functools.partial(_cel_kernel, n_rows=n, tiles_per_slice=tiles_per_slice)

    partials = pl.pallas_call(
        kernel,
        out_shape=jax.ShapeDtypeStruct((num_slices, 1, 1), jnp.float32),
        grid_spec=pltpu.PrefetchScalarGridSpec(
            num_scalar_prefetch=0,
            grid=(num_slices, tiles_per_slice),
            in_specs=[
                pl.BlockSpec((tm, d), lambda c, t: (row_block(c, t), 0)),
                pl.BlockSpec((tm, d), lambda c, t: (row_block(c, t), 0)),
                pl.BlockSpec((tm, 1), lambda c, t: (row_block(c, t), 0)),
            ],
            out_specs=pl.BlockSpec((1, 1, 1), lambda c, t: (c, 0, 0)),
        ),
        compiler_params=pltpu.CompilerParams(
            dimension_semantics=("parallel", "arbitrary"),
            vmem_limit_bytes=_VMEM_LIMIT_BYTES,
        ),
    )(x, y, lab2d)

    return (jnp.sum(partials) / n).astype(jnp.float32)


def _reference(x, y, label):
    xf = x.astype(jnp.float32)
    yf = y.astype(jnp.float32)
    dot = jnp.sum(xf * yf, axis=-1)
    nx = jnp.sum(xf * xf, axis=-1) + _EPS
    ny = jnp.sum(yf * yf, axis=-1) + _EPS
    cos = dot / jnp.sqrt(nx * ny)
    per = jnp.where(label > 0, 1.0 - cos, jnp.maximum(cos - _MARGIN, 0.0))
    return jnp.mean(per)


if __name__ == "__main__":
    key = jax.random.PRNGKey(0)
    kx, ky, kl = jax.random.split(key, 3)

    # Small shapes consistent with a (batch, features) cosine embedding loss.
    N, D = 8, 32
    x = jax.random.normal(kx, (N, D), dtype=jnp.float32)
    y = jax.random.normal(ky, (N, D), dtype=jnp.float32)
    label = jnp.where(jax.random.bernoulli(kl, 0.5, (N,)), 1, -1).astype(jnp.int32)

    out = jax.block_until_ready(cosine_embedding_loss(x, y, label))
    ref = _reference(x, y, label)
    assert jnp.allclose(out, ref, atol=1e-5, rtol=1e-5), (out, ref)

    # Ragged-tail masking with the default tile (single ragged block, no padding).
    N2 = 13
    x2 = jax.random.normal(kx, (N2, D), dtype=jnp.float32)
    y2 = jax.random.normal(ky, (N2, D), dtype=jnp.float32)
    label2 = jnp.where(jax.random.bernoulli(kl, 0.5, (N2,)), 1, -1).astype(jnp.int32)
    out2 = jax.block_until_ready(cosine_embedding_loss(x2, y2, label2))
    ref2 = _reference(x2, y2, label2)
    assert jnp.allclose(out2, ref2, atol=1e-5, rtol=1e-5), (out2, ref2)

    # Multi-block / two-slice accumulation path (forced small tile).
    out3 = jax.block_until_ready(cosine_embedding_loss(x2, y2, label2, tm=8))
    assert jnp.allclose(out3, ref2, atol=1e-5, rtol=1e-5), (out3, ref2)

    # zero_size path (matches PyTorch: mean over empty batch -> NaN).
    z = cosine_embedding_loss(
        jnp.zeros((0, D), jnp.float32),
        jnp.zeros((0, D), jnp.float32),
        jnp.zeros((0,), jnp.int32),
    )
    assert jnp.isnan(z)

    print("KERNEL_OK")
</pallas_src>

<mosaic_0001>
module attributes {stable_mosaic.version = 11 : i64} {
  func.func @_cel_kernel(%arg0: i32, %arg1: i32, %arg2: memref<8x32xf32, #tpu.memory_space<vmem>>, %arg3: memref<8x32xf32, #tpu.memory_space<vmem>>, %arg4: memref<8x1xf32, #tpu.memory_space<vmem>>, %arg5: memref<1x1x1xf32, #tpu.memory_space<vmem>>) attributes {dimension_semantics = [#tpu.dimension_semantics<parallel>, #tpu.dimension_semantics<arbitrary>], iteration_bounds = array<i64: 1, 1>, scalar_prefetch = 0 : i64, scratch_operands = 0 : i64, tpu.core_type = #tpu.core_type<tc>, window_params = [{transform_indices = @transform_0, window_bounds = array<i64: 8, 32>}, {transform_indices = @transform_1, window_bounds = array<i64: 8, 32>}, {transform_indices = @transform_2, window_bounds = array<i64: 8, 1>}, {transform_indices = @transform_3, window_bounds = array<i64: 1, 1, 1>}]} {
    %c0_i32 = arith.constant 0 : i32
    %0 = arith.cmpi eq, %arg1, %c0_i32 : i32
    %1 = arith.extui %0 : i1 to i32
    %c0_i32_0 = arith.constant 0 : i32
    %2 = arith.cmpi ne, %1, %c0_i32_0 : i32
    scf.if %2 {
      %cst_23 = arith.constant 0.000000e+00 : f32
      %47 = vector.broadcast %cst_23 : f32 to vector<1x1x1xf32>
      %c0_24 = arith.constant 0 : index
      %c0_25 = arith.constant 0 : index
      %c0_26 = arith.constant 0 : index
      %48 = vector.load %arg5[%c0_24, %c0_25, %c0_26] : memref<1x1x1xf32, #tpu.memory_space<vmem>>, vector<1x1x1xf32>
      tpu.vector_store %arg5[%c0_24, %c0_25, %c0_26], %47 {strides = array<i32>} : memref<1x1x1xf32, #tpu.memory_space<vmem>>, vector<1x1x1xf32>,
    } else {
    }
    %c0 = arith.constant 0 : index
    %c0_1 = arith.constant 0 : index
    %3 = vector.load %arg2[%c0, %c0_1] : memref<8x32xf32, #tpu.memory_space<vmem>>, vector<8x32xf32>
    %c0_2 = arith.constant 0 : index
    %c0_3 = arith.constant 0 : index
    %4 = vector.load %arg3[%c0_2, %c0_3] : memref<8x32xf32, #tpu.memory_space<vmem>>, vector<8x32xf32>
    %c0_4 = arith.constant 0 : index
    %c0_5 = arith.constant 0 : index
    %5 = vector.load %arg4[%c0_4, %c0_5] : memref<8x1xf32, #tpu.memory_space<vmem>>, vector<8x1xf32>
    %6 = arith.mulf %3, %4 : vector<8x32xf32>
    %cst = arith.constant dense<0.000000e+00> : vector<8xf32>
    %7 = vector.multi_reduction <add>, %6, %cst [1] : vector<8x32xf32> to vector<8xf32>
    %8 = vector.shape_cast %7 : vector<8xf32> to vector<8x1xf32>
    %9 = arith.mulf %3, %3 : vector<8x32xf32>
    %cst_6 = arith.constant dense<0.000000e+00> : vector<8xf32>
    %10 = vector.multi_reduction <add>, %9, %cst_6 [1] : vector<8x32xf32> to vector<8xf32>
    %11 = vector.shape_cast %10 : vector<8xf32> to vector<8x1xf32>
    %cst_7 = arith.constant 9.99999996E-13 : f32
    %12 = vector.broadcast %cst_7 : f32 to vector<8x1xf32>
    %13 = arith.addf %11, %12 : vector<8x1xf32>
    %14 = arith.mulf %4, %4 : vector<8x32xf32>
    %cst_8 = arith.constant dense<0.000000e+00> : vector<8xf32>
    %15 = vector.multi_reduction <add>, %14, %cst_8 [1] : vector<8x32xf32> to vector<8xf32>
    %16 = vector.shape_cast %15 : vector<8xf32> to vector<8x1xf32>
    %cst_9 = arith.constant 9.99999996E-13 : f32
    %17 = vector.broadcast %cst_9 : f32 to vector<8x1xf32>
    %18 = arith.addf %16, %17 : vector<8x1xf32>
    %19 = arith.mulf %13, %18 : vector<8x1xf32>
    %20 = math.rsqrt %19 : vector<8x1xf32>
    %21 = arith.mulf %8, %20 : vector<8x1xf32>
    %cst_10 = arith.constant 1.000000e+00 : f32
    %22 = vector.broadcast %cst_10 : f32 to vector<8x1xf32>
    %23 = arith.subf %22, %21 : vector<8x1xf32>
    %cst_11 = arith.constant 0.000000e+00 : f32
    %24 = vector.broadcast %cst_11 : f32 to vector<8x1xf32>
    %25 = arith.subf %21, %24 : vector<8x1xf32>
    %cst_12 = arith.constant 0.000000e+00 : f32
    %26 = vector.broadcast %cst_12 : f32 to vector<8x1xf32>
    %27 = arith.maximumf %25, %26 : vector<8x1xf32>
    %cst_13 = arith.constant 0.000000e+00 : f32
    %28 = vector.broadcast %cst_13 : f32 to vector<8x1xf32>
    %29 = arith.cmpf ogt, %5, %28 : vector<8x1xf32>
    %30 = arith.select %29, %23, %27 : vector<8x1xi1>, vector<8x1xf32>
    %c1_i32 = arith.constant 1 : i32
    %31 = arith.muli %arg0, %c1_i32 : i32
    %32 = arith.addi %31, %arg1 : i32
    %c8_i32 = arith.constant 8 : i32
    %33 = arith.muli %32, %c8_i32 : i32
    %34 = tpu.iota {dimensions = array<i32: 0>} : vector<8x1xi32>
    %35 = vector.broadcast %33 : i32 to vector<8x1xi32>
    %36 = arith.addi %35, %34 : vector<8x1xi32>
    %c8_i32_14 = arith.constant 8 : i32
    %37 = vector.broadcast %c8_i32_14 : i32 to vector<8x1xi32>
    %38 = arith.cmpi slt, %36, %37 : vector<8x1xi32>
    %cst_15 = arith.constant 0.000000e+00 : f32
    %39 = vector.broadcast %cst_15 : f32 to vector<8x1xf32>
    %40 = arith.select %38, %30, %39 : vector<8x1xi1>, vector<8x1xf32>
    %c0_16 = arith.constant 0 : index
    %c0_17 = arith.constant 0 : index
    %c0_18 = arith.constant 0 : index
    %41 = vector.load %arg5[%c0_16, %c0_17, %c0_18] : memref<1x1x1xf32, #tpu.memory_space<vmem>>, vector<1x1x1xf32>
    %cst_19 = arith.constant dense<0.000000e+00> : vector<1xf32>
    %42 = vector.multi_reduction <add>, %40, %cst_19 [0] : vector<8x1xf32> to vector<1xf32>
    %43 = vector.shape_cast %42 : vector<1xf32> to vector<1x1xf32>
    %44 = vector.shape_cast %43 : vector<1x1xf32> to vector<1x1x1xf32>
    %45 = arith.addf %41, %44 : vector<1x1x1xf32>
    %c0_20 = arith.constant 0 : index
    %c0_21 = arith.constant 0 : index
    %c0_22 = arith.constant 0 : index
    %46 = vector.load %arg5[%c0_20, %c0_21, %c0_22] : memref<1x1x1xf32, #tpu.memory_space<vmem>>, vector<1x1x1xf32>
    tpu.vector_store %arg5[%c0_20, %c0_21, %c0_22], %45 {strides = array<i32>} : memref<1x1x1xf32, #tpu.memory_space<vmem>>, vector<1x1x1xf32>,
    return
  }
  func.func @transform_0(%arg0: i32, %arg1: i32) -> (i32, i32) {
    %c1_i32 = arith.constant 1 : i32
    %0 = arith.muli %arg0, %c1_i32 : i32
    %1 = arith.addi %0, %arg1 : i32
    %c0_i32 = arith.constant 0 : i32
    %2 = arith.minsi %1, %c0_i32 : i32
    %c0_i32_0 = arith.constant 0 : i32
    %c0_i32_1 = arith.constant 0 : i32
    return %2, %c0_i32_0 : i32, i32
  }
  func.func @transform_1(%arg0: i32, %arg1: i32) -> (i32, i32) {
    %c1_i32 = arith.constant 1 : i32
    %0 = arith.muli %arg0, %c1_i32 : i32
    %1 = arith.addi %0, %arg1 : i32
    %c0_i32 = arith.constant 0 : i32
    %2 = arith.minsi %1, %c0_i32 : i32
    %c0_i32_0 = arith.constant 0 : i32
    %c0_i32_1 = arith.constant 0 : i32
    return %2, %c0_i32_0 : i32, i32
  }
  func.func @transform_2(%arg0: i32, %arg1: i32) -> (i32, i32) {
    %c1_i32 = arith.constant 1 : i32
    %0 = arith.muli %arg0, %c1_i32 : i32
    %1 = arith.addi %0, %arg1 : i32
    %c0_i32 = arith.constant 0 : i32
    %2 = arith.minsi %1, %c0_i32 : i32
    %c0_i32_0 = arith.constant 0 : i32
    %c0_i32_1 = arith.constant 0 : i32
    return %2, %c0_i32_0 : i32, i32
  }
  func.func @transform_3(%arg0: i32, %arg1: i32) -> (i32, i32, i32) {
    %c0_i32 = arith.constant 0 : i32
    %c0_i32_0 = arith.constant 0 : i32
    %c0_i32_1 = arith.constant 0 : i32
    return %arg0, %c0_i32, %c0_i32_0 : i32, i32, i32
  }
}

</mosaic_0001>

<bundles_post_ra>
// kernel: tpu_custom_call.1
= control target key start
LH: loop header
LB: loop body
LE: loop exit
PB: predicated region body
PF: predicated region fallthrough
CT: control target
= control target key end

     0   :  { %8 = vsyncpa [#allocation3], 0  ;;  %s277_s0 = inlined_call_operand.vmem [shape: f32[8,32], index: 0, kind: input, shape index: {}]   ;;  %s278_s1 = inlined_call_operand.hbm [shape: f32[8,32], index: 1, kind: input, shape index: {}]   ;;  %s279_s2 = inlined_call_operand.vmem [shape: f32[8,1], index: 2, kind: input, shape index: {}]   ;;  %s280_s3 = inlined_call_operand.hbm [shape: f32[1,1,1], index: 3, kind: output, shape index: {}]  }
   0x1   :  { %9 = vsyncpa [#allocation4], 0  ;;  %s222_s12 = smov [#allocation2]   ;;  %s174_s16 = scalar_lea.hbm %s278_s1, 128 }
   0x2   :  { %s33_s13 = sshll.u32 %s222_s12, 4  ;;  %p175_p0 = scmp.ne.s32.totalorder %s278_s1, %s174_s16  ;;  %s34_s13 = int_to_ptr.vmem [resolvable:$true] %s33_s13 }
   0x3   :  { %p178_p1 = scmp.lt.u32.totalorder %s174_s16, %s278_s1 }
   0x5   :  { %p180_p2 = pnand %p178_p1, %p175_p0 }
   0x7   :  { %183 = shalt.err (!%p180_p2)
}
   0x8   :  { %s184_s21 = scalar_lea.vmem %s34_s13, 128  ;;  %p189_p4 = scmp.lt.s32.totalorder %s34_s13, %s34_s13 }
   0x9   :  { %p185_p3 = scmp.ne.s32.totalorder %s34_s13, %s184_s21  ;;  %p190_p5 = scmp.lt.s32.totalorder %s184_s21, %s184_s21 }
   0xb   :  { %p191_p6 = por %p190_p5, %p189_p4 }
   0xd   :  { %p192_p7 = pnand %p191_p6, %p185_p3 }
   0xf   :  { %195 = shalt.err (!%p192_p7)
}
  0x10   :  { %36 = dma.hbm_to_vmem [thread:$0]  %s278_s1, 128, %s34_s13, [#allocation3]  }
  0x11   :  { %218 = dma.done.wait [#allocation3], 128  }
  0x12   :  { %219 = vsyncadd [#allocation3], 4294967168  ;;  %v95_v0 = vld [vmem:[%s277_s0] sm:$0xff]  ;;  %vm99_vm0 = vcmask 261120   ;;  %vm93_vm1 = vcmask 0   ;;  %v223_v8 = vmov 0.0  }
  0x13   :  { %v96_v1 = vld [vmem:[#allocation2] sm:$0xff]  ;;  %v103_v2 = vmul.f32 %v95_v0, %v95_v0  ;;  %94 = vst.msk [vmem:[#allocation5] sm:$0x1] %vm93_vm1, %v223_v8  ;;  %vm129_vm3 = vcmask 7168   ;;  %s224_s26 = smov [#allocation5]  }
  0x14   :  { %v108_v3 = vmul.f32 %v96_v1, %v96_v1  ;;  %v98_v4 = vmul.f32 %v96_v1, %v95_v0  ;;  %v97_v15 = vld [vmem:[%s279_s2] sm:$0xff]  ;;  %s146_s27 = sshll.u32 %s224_s26, 4  ;;  %s147_s27 = int_to_ptr.vmem [resolvable:$true] %s146_s27 }
  0x15   :  { %v104_v5 = vsel %vm99_vm0, %v103_v2, 0.0  ;;  %vm118_vm2 = vcmp.gt.f32.partialorder %v97_v15, 0.0  ;;  %s196_s2 = scalar_lea.vmem %s147_s27, 16  ;;  %s200_s28 = scalar_lea.vmem %s147_s27, 32 }
  0x16   :  { %v100_v6 = vsel %vm99_vm0, %v98_v4, 0.0  ;;  %105 = vadd.xlane.f32.xlu0 %v104_v5  ;;  %v109_v7 = vsel %vm99_vm0, %v108_v3, 0.0  ;;  %p197_p8 = scmp.ne.s32.totalorder %s147_s27, %s196_s2  ;;  %p201_p9 = scmp.lt.s32.totalorder %s147_s27, %s147_s27 }
  0x17   :  { %101 = vadd.xlane.f32.xlu1 %v100_v6  ;;  %p202_p10 = scmp.lt.s32.totalorder %s200_s28, %s196_s2 }
  0x19   :  { %p203_p11 = por %p202_p10, %p201_p9 }
  0x1a   :  { %110 = vadd.xlane.f32.xlu0 %v109_v7  ;;  %v128_v27 = vld [vmem:[#allocation5] sm:$0x1] }
  0x1b   :  { %p204_p12 = pnand %p203_p11, %p197_p8 }
  0xa3   :  { %v106_v9 = vpop.xlane.xlu0 %105 }
  0xa4   :  { %v107_v11 = vadd.f32 1e-12, %v106_v9  ;;  %v102_v14 = vpop.xlane.xlu1 %101 }
  0xa7   :  { %v111_v10 = vpop.xlane.xlu0 %110 }
  0xa8   :  { %v112_v12 = vadd.f32 1e-12, %v111_v10 }
  0xaa   :  { %v113_v13 = vmul.f32 %v112_v12, %v107_v11 }
  0xac   :  { %172 = vrsqrt.f32 %v113_v13 }
  0xb6   :  { %v173_v16 = vpop.eup %172 }
  0xb7   :  { %v115_v17 = vmul.f32 %v173_v16, %v102_v14 }
  0xb9   :  { %v116_v18 = vsub.f32 1.0, %v115_v17  ;;  %v117_v19 = vmax.f32 %v115_v17, 0.0 }
  0xbb   :  { %v119_v20 = vsel %vm118_vm2, %v116_v18, %v117_v19 }
  0xbc   :  { %v130_v21 = vsel %vm129_vm3, %v119_v20, 0.0 }
  0xbd   :  { %v131_v22 = vrot.slane %v130_v21, 4 }
  0xbf   :  { %v132_v23 = vadd.f32 %v131_v22, %v130_v21 }
  0xc1   :  { %v133_v24 = vrot.slane %v132_v23, 2 }
  0xc3   :  { %v134_v25 = vadd.f32 %v133_v24, %v132_v23 }
  0xc5   :  { %v135_v26 = vrot.slane %v134_v25, 1 }
  0xc7   :  { %v136_v28 = vadd.f32 %v135_v26, %v134_v25 }
  0xc9   :  { %v137_v29 = vadd.f32 %v136_v28, %v128_v27 }
  0xcb   :  { %139 = vst.msk [vmem:[#allocation5] sm:$0x1] %vm93_vm1, %v137_v29 }
  0xcc   :  { %207 = shalt.err (!%p204_p12)
}
  0xcd   :  { %s208_s4 = scalar_lea.hbm %s280_s3, 16 }
  0xce   :  { %p209_p13 = scmp.ne.s32.totalorder %s280_s3, %s208_s4  ;;  %p212_p0 = scmp.lt.u32.totalorder %s208_s4, %s280_s3 }
  0xd0   :  { %p214_p1 = pnand %p212_p0, %p209_p13 }
  0xd2   :  { %217 = shalt.err (!%p214_p1)
}
  0xd3   :  { %149 = dma.vmem_to_hbm [thread:$0]  %s147_s27, 16, %s280_s3, [#allocation4]  }
  0xd4   :  { %220 = dma.done.wait [#allocation4], 16  }
  0xd5   :  { %221 = vsyncadd [#allocation4], 4294967280 }
  0xd6   :  { %153 = vsyncpa [#allocation3], 1 }
  0xd7   :  { %154 = vsyncpa [#allocation4], 1 }

</bundles_post_ra>
